<compile_context>
chip_gen: v7x
topology: tpu7x:2x2x1
jax: 0.10.0
libtpu: 0.0.40
codegen_flags: <defaults>
</compile_context>

<pallas_src>
import functools

import jax
import jax.numpy as jnp
from jax.experimental import pallas as pl
from jax.experimental.pallas import tpu as pltpu

LANE = 128      # vreg lane width
SUBLANE = 8     # vreg sublane count (f32)


def _round_up(x, m):
    return ((x + m - 1) // m) * m


def action_encoder_kernel(x_ref, w_ref, b_ref, o_ref):
    # x_ref: (TB, in_dim)        -- streamed per grid step
    # w_ref: (in_dim, out_dim)   -- resident across steps (constant index_map)
    # b_ref: (1, out_dim)        -- resident across steps
    # o_ref: (TB, out_dim)       -- unpadded; full-extent lane block
    acc = jnp.dot(x_ref[...], w_ref[...], preferred_element_type=jnp.float32)
    acc = acc + b_ref[...]                       # bias broadcast over rows (f32)
    o_ref[...] = jnp.maximum(acc, 0.0).astype(o_ref.dtype)


def prepare_params(weight, bias, dtype=None):
    """One-time parameter prep (do this OUTSIDE the hot path / at init):
    transpose W to (in_dim, out_dim) and reshape bias to (1, out_dim).
    Pass dtype=jnp.bfloat16 to halve the HBM stream for W (and let callers
    feed bf16 activations) -- the MXU still accumulates in f32 inside the
    kernel.  Default keeps f32 for parity with the PyTorch module."""
    w_t = weight.T
    b2d = bias.reshape(1, -1)
    if dtype is not None:
        w_t = w_t.astype(dtype)
        b2d = b2d.astype(dtype)
    return w_t, b2d


@functools.partial(jax.jit, static_argnames=("block_b", "min_kernel_batch"))
def action_encoder(action, w_t, b2d, *, block_b=2048, min_kernel_batch=256):
    """action: (B, in_dim); w_t: (in_dim, out_dim); b2d: (1, out_dim)."""
    B, in_dim = action.shape
    out_dim = w_t.shape[1]

    # Tiny batches: a single-step Pallas grid is pure Mosaic launch + DMA
    # overhead for a problem that fits in a few vregs; XLA's fused
    # dot+bias+relu matches or beats it on every generation.  (B is a
    # trace-time constant, so this branch is resolved at compile time.)
    if B < min_kernel_batch:
        return jnp.maximum(action @ w_t + b2d, 0.0).astype(action.dtype)

    itemsize = jnp.dtype(action.dtype).itemsize

    # Batch tile selection:
    #  * as large as block_b to amortize the ~0.35 us/step grid overhead
    #    (this kernel is entirely HBM/launch bound),
    #  * but no more than ~half the batch (rounded to a sublane multiple) so
    #    the grid has >= 2 steps and v7x's second TensorCore gets work,
    #  * and clamped so double-buffered x/out tiles stay well inside the
    #    scoped-VMEM default (headroom for v7x's 64 MiB physical VMEM).
    vmem_budget = 16 * 1024 * 1024
    bytes_per_row = (in_dim + out_dim) * itemsize
    max_rows = max(SUBLANE,
                   ((vmem_budget // (2 * bytes_per_row)) // SUBLANE) * SUBLANE)
    half_b = max(SUBLANE, _round_up(pl.cdiv(B, 2), SUBLANE))
    tb = min(block_b, max_rows, half_b)
    grid = (pl.cdiv(B, tb),)

    # Partial last tile: out-of-bounds output rows are discarded by Pallas and
    # each row depends only on its own input row, so this stays correct.
    out = pl.pallas_call(
        action_encoder_kernel,
        out_shape=jax.ShapeDtypeStruct((B, out_dim), action.dtype),
        grid=grid,
        in_specs=[
            pl.BlockSpec((tb, in_dim), lambda i: (i, 0)),        # x: per-tile stream
            pl.BlockSpec((in_dim, out_dim), lambda i: (0, 0)),   # W: resident
            pl.BlockSpec((1, out_dim), lambda i: (0, 0)),        # b: resident
        ],
        out_specs=pl.BlockSpec((tb, out_dim), lambda i: (i, 0)),
        compiler_params=pltpu.CompilerParams(
            dimension_semantics=("parallel",)),  # v7x: shard batch over 2 TCs
    )(action, w_t, b2d)
    return out


if __name__ == "__main__":
    # Small shapes consistent with the module: batch=8 actions of dim 32 -> 64.
    B, in_dim, out_dim = 8, 32, 64

    key = jax.random.PRNGKey(0)
    k_x, k_w, k_b = jax.random.split(key, 3)

    # Deterministic params mimicking nn.Linear default init U(-1/sqrt(in), 1/sqrt(in)).
    bound = 1.0 / (in_dim ** 0.5)
    weight = jax.random.uniform(k_w, (out_dim, in_dim), jnp.float32, -bound, bound)
    bias = jax.random.uniform(k_b, (out_dim,), jnp.float32, -bound, bound)
    action = jax.random.normal(k_x, (B, in_dim), jnp.float32)

    # One-time param prep (transpose), then the hot call.
    w_t, b2d = prepare_params(weight, bias)

    # Force the Pallas path at this tiny demo batch (min_kernel_batch=0);
    # production callers keep the default gate (~256 rows) and get the cheap
    # fused-XLA fallback for tiny batches.
    out = action_encoder(action, w_t, b2d, min_kernel_batch=0)
    out = jax.block_until_ready(out)

    # Reference check in plain JAX.
    ref = jnp.maximum(action @ weight.T + bias, 0.0)
    assert out.shape == (B, out_dim)
    assert jnp.allclose(out, ref, atol=1e-5, rtol=1e-5)

    # The default small-batch fallback path must agree as well.
    out_fb = jax.block_until_ready(action_encoder(action, w_t, b2d))
    assert jnp.allclose(out_fb, ref, atol=1e-5, rtol=1e-5)

    print("KERNEL_OK")
</pallas_src>

<mosaic_0001>
module attributes {stable_mosaic.version = 11 : i64} {
  func.func @action_encoder_kernel(%arg0: i32, %arg1: memref<8x32xf32, #tpu.memory_space<vmem>>, %arg2: memref<32x64xf32, #tpu.memory_space<vmem>>, %arg3: memref<1x64xf32, #tpu.memory_space<vmem>>, %arg4: memref<8x64xf32, #tpu.memory_space<vmem>>) attributes {dimension_semantics = [#tpu.dimension_semantics<parallel>], iteration_bounds = array<i64: 1>, scalar_prefetch = 0 : i64, scratch_operands = 0 : i64, tpu.core_type = #tpu.core_type<tc>, window_params = [{transform_indices = @transform_0, window_bounds = array<i64: 8, 32>}, {pipeline_mode = #tpu.pipeline_mode<synchronous>, transform_indices = @transform_1, window_bounds = array<i64: 32, 64>}, {pipeline_mode = #tpu.pipeline_mode<synchronous>, transform_indices = @transform_2, window_bounds = array<i64: 1, 64>}, {transform_indices = @transform_3, window_bounds = array<i64: 8, 64>}]} {
    %c0 = arith.constant 0 : index
    %c0_0 = arith.constant 0 : index
    %0 = vector.load %arg1[%c0, %c0_0] : memref<8x32xf32, #tpu.memory_space<vmem>>, vector<8x32xf32>
    %c0_1 = arith.constant 0 : index
    %c0_2 = arith.constant 0 : index
    %1 = vector.load %arg2[%c0_1, %c0_2] : memref<32x64xf32, #tpu.memory_space<vmem>>, vector<32x64xf32>
    %cst = arith.constant dense<0.000000e+00> : vector<8x64xf32>
    %2 = tpu.matmul %0, %1, %cst {dimension_numbers = #tpu.dot_dimension_numbers<[1], [0], [0], [1], [0, 0, 1, 1], [], []>} : vector<8x32xf32>, vector<32x64xf32>, vector<8x64xf32> -> vector<8x64xf32>
    %c0_3 = arith.constant 0 : index
    %c0_4 = arith.constant 0 : index
    %3 = vector.load %arg3[%c0_3, %c0_4] : memref<1x64xf32, #tpu.memory_space<vmem>>, vector<1x64xf32>
    %4 = vector.broadcast %3 : vector<1x64xf32> to vector<8x64xf32>
    %5 = arith.addf %2, %4 : vector<8x64xf32>
    %cst_5 = arith.constant 0.000000e+00 : f32
    %6 = vector.broadcast %cst_5 : f32 to vector<8x64xf32>
    %7 = arith.maximumf %5, %6 : vector<8x64xf32>
    %c0_6 = arith.constant 0 : index
    %c0_7 = arith.constant 0 : index
    %8 = vector.load %arg4[%c0_6, %c0_7] : memref<8x64xf32, #tpu.memory_space<vmem>>, vector<8x64xf32>
    tpu.vector_store %arg4[%c0_6, %c0_7], %7 {strides = array<i32>} : memref<8x64xf32, #tpu.memory_space<vmem>>, vector<8x64xf32>,
    return
  }
  func.func @transform_0(%arg0: i32) -> (i32, i32) {
    %c0_i32 = arith.constant 0 : i32
    %c0_i32_0 = arith.constant 0 : i32
    return %arg0, %c0_i32 : i32, i32
  }
  func.func @transform_1(%arg0: i32) -> (i32, i32) {
    %c0_i32 = arith.constant 0 : i32
    %c0_i32_0 = arith.constant 0 : i32
    %c0_i32_1 = arith.constant 0 : i32
    return %c0_i32, %c0_i32_0 : i32, i32
  }
  func.func @transform_2(%arg0: i32) -> (i32, i32) {
    %c0_i32 = arith.constant 0 : i32
    %c0_i32_0 = arith.constant 0 : i32
    %c0_i32_1 = arith.constant 0 : i32
    return %c0_i32, %c0_i32_0 : i32, i32
  }
  func.func @transform_3(%arg0: i32) -> (i32, i32) {
    %c0_i32 = arith.constant 0 : i32
    %c0_i32_0 = arith.constant 0 : i32
    return %arg0, %c0_i32 : i32, i32
  }
}

</mosaic_0001>

<bundles_post_ra>
// kernel: action_encoder.1
= control target key start
LH: loop header
LB: loop body
LE: loop exit
PB: predicated region body
PF: predicated region fallthrough
CT: control target
= control target key end

     0   :  { %8 = vsyncpa [#allocation3], 0  ;;  %s324_s0 = inlined_call_operand.hbm [shape: f32[8,32], index: 0, kind: input, shape index: {}]   ;;  %s325_s1 = inlined_call_operand.hbm [shape: f32[32,64], index: 1, kind: input, shape index: {}]   ;;  %s326_s2 = inlined_call_operand.vmem [shape: f32[1,64], index: 2, kind: input, shape index: {}]   ;;  %s327_s3 = inlined_call_operand.hbm [shape: f32[8,64], index: 3, kind: output, shape index: {}]  }
   0x1   :  { %9 = vsyncpa [#allocation6], 0 }
   0x2   :  { %10 = vsyncpa [#allocation4], 0  ;;  %s250_s12 = smov [#allocation2]   ;;  %s251_s14 = smov [#allocation5]  }
   0x3   :  { %s17_s13 = sshll.u32 %s250_s12, 4  ;;  %s26_s15 = sshll.u32 %s251_s14, 4  ;;  %s18_s13 = int_to_ptr.vmem [resolvable:$true] %s17_s13  ;;  %s278_s15 = int_to_ptr.vmem [resolvable:$true] %s26_s15 }
   0x4   :  { %s178_s18 = scalar_lea.hbm %s324_s0, 128 }
   0x5   :  { %p179_p0 = scmp.ne.s32.totalorder %s324_s0, %s178_s18  ;;  %p182_p1 = scmp.lt.u32.totalorder %s178_s18, %s324_s0 }
   0x7   :  { %p184_p2 = pnand %p182_p1, %p179_p0 }
   0x9   :  { %187 = shalt.err (!%p184_p2)
}
   0xa   :  { %s188_s23 = scalar_lea.vmem %s18_s13, 128  ;;  %p193_p4 = scmp.lt.s32.totalorder %s18_s13, %s18_s13 }
   0xb   :  { %p189_p3 = scmp.ne.s32.totalorder %s18_s13, %s188_s23  ;;  %p194_p5 = scmp.lt.s32.totalorder %s188_s23, %s188_s23 }
   0xd   :  { %p195_p6 = por %p194_p5, %p193_p4 }
   0xf   :  { %p196_p7 = pnand %p195_p6, %p189_p3 }
  0x11   :  { %199 = shalt.err (!%p196_p7)
}
  0x12   :  { %20 = dma.hbm_to_vmem [thread:$0]  %s324_s0, 128, %s18_s13, [#allocation3]  }
  0x13   :  { %s200_s28 = scalar_lea.hbm %s325_s1, 512 }
  0x14   :  { %p201_p8 = scmp.ne.s32.totalorder %s325_s1, %s200_s28  ;;  %p204_p9 = scmp.lt.u32.totalorder %s200_s28, %s325_s1 }
  0x16   :  { %p206_p10 = pnand %p204_p9, %p201_p8 }
  0x18   :  { %209 = shalt.err (!%p206_p10)
}
  0x19   :  { %s210_s6 = scalar_lea.vmem %s278_s15, 512  ;;  %p215_p12 = scmp.lt.s32.totalorder %s278_s15, %s278_s15 }
  0x1a   :  { %p211_p11 = scmp.ne.s32.totalorder %s278_s15, %s210_s6  ;;  %p216_p13 = scmp.lt.s32.totalorder %s210_s6, %s210_s6 }
  0x1c   :  { %p217_p0 = por %p216_p13, %p215_p12 }
  0x1e   :  { %p218_p1 = pnand %p217_p0, %p211_p11 }
  0x20   :  { %221 = shalt.err (!%p218_p1)
}
  0x21   :  { %s252_s0 = smov 128   ;;  %s253_s7 = smov 8  }
  0x22   :  { %32 = dma.hbm_to_vmem [thread:$0]  %s325_s1, 512, %s278_s15, [#allocation6], %s252_s0, %s252_s0, %s253_s7  }
  0x23   :  { %244 = dma.done.wait [#allocation3], 128  }
  0x24   :  { %245 = vsyncadd [#allocation3], 4294967168 }
  0x25   :  { %246 = dma.done.wait [#allocation6], 512  }
  0x26   :  { %247 = vsyncadd [#allocation6], 4294966784  ;;  %v254_v0 = vmov 0.0|0.0   ;;  %vm255_vm0 = vmmov 0   ;;  %v256_v1 = vmov 0.0   ;;  %v42_v2 = vld [vmem:[#allocation5] sm:$0xff] }
  0x27   :  { %164 = vmatprep.subr.bf16.mxu0 %v254_v0  ;;  %161 = vmatprep.mubr.msk.f32.mxu0 %vm255_vm0, %v256_v1  ;;  %v43_v3 = vld [vmem:[#allocation5 + $0x8] sm:$0xff]  ;;  %v44_v4 = vld [vmem:[#allocation5 + $0x10] sm:$0xff]  ;;  %v45_v6 = vld [vmem:[#allocation5 + $0x18] sm:$0xff]  ;;  %vm53_vm1 = vcmask 261120   ;;  %s257_s11 = smov [#allocation7]   ;;  %vm128_vm2 = vcmask 523264  }
  0x28   :  { %v165_v5 = vpack.c.bf16 %v43_v3, %v42_v2  ;;  %v168_v7 = vpack.c.bf16 %v45_v6, %v44_v4  ;;  %v41_v8 = vld [vmem:[#allocation2] sm:$0xff]  ;;  %s136_s12 = sshll.u32 %s257_s11, 4  ;;  %s137_s12 = int_to_ptr.vmem [resolvable:$true] %s136_s12 }
  0x29   :  { %v146_v9 = vld [vmem:[%s326_s2] ss:$0 sm:$0xff]  ;;  %s222_s13 = scalar_lea.vmem %s137_s12, 128  ;;  %p227_p3 = scmp.lt.s32.totalorder %s137_s12, %s137_s12 }
  0x2a   :  { %166 = vmatpush3.bf16.msra.mxu0 %v165_v5  ;;  %p223_p2 = scmp.ne.s32.totalorder %s137_s12, %s222_s13  ;;  %p228_p4 = scmp.lt.s32.totalorder %s222_s13, %s222_s13 }
  0x2b   :  { %167 = vmatprep.subr.bf16.mxu0 %v254_v0 }
  0x2c   :  { %p229_p5 = por %p228_p4, %p227_p3 }
  0x2e   :  { %169 = vmatpush3.bf16.msra.mxu0 %v168_v7  ;;  %p230_p6 = pnand %p229_p5, %p223_p2 }
  0x31   :  { %162 = vmatmul.mubr.msk.f32.vlgmr.msra.gmra.mrb[0].mxu0 %vm53_vm1, %v41_v8 }
 0x104   :  { %v123_v10 = vpop.f32.mrb[0].mxu0 }
 0x105   :  { %v124_v11 = vadd.f32 %v146_v9, %v123_v10  ;;  %v163_v12 = vpop.f32.mrb[1].mxu0 }
 0x107   :  { %v127_v13 = vmax.f32 %v124_v11, 0.0 }
 0x109   :  { %129 = vst.msk [vmem:[#allocation7] sm:$0xff] %vm128_vm2, %v127_v13 }
 0x10a   :  { %233 = shalt.err (!%p230_p6)
}
 0x10b   :  { %s234_s2 = scalar_lea.hbm %s327_s3, 128 }
 0x10c   :  { %p235_p7 = scmp.ne.s32.totalorder %s327_s3, %s234_s2  ;;  %p238_p8 = scmp.lt.u32.totalorder %s234_s2, %s327_s3 }
 0x10e   :  { %p240_p9 = pnand %p238_p8, %p235_p7 }
 0x110   :  { %243 = shalt.err (!%p240_p9)
}
 0x111   :  { %139 = dma.vmem_to_hbm [thread:$0]  %s137_s12, 128, %s327_s3, [#allocation4]  }
 0x112   :  { %248 = dma.done.wait [#allocation4], 128  }
 0x113   :  { %249 = vsyncadd [#allocation4], 4294967168 }
 0x114   :  { %143 = vsyncpa [#allocation3], 1 }
 0x115   :  { %144 = vsyncpa [#allocation6], 1 }
 0x116   :  { %145 = vsyncpa [#allocation4], 1 }

</bundles_post_ra>
